<compile_context>
chip_gen: v7x
topology: tpu7x:2x2x1
jax: 0.10.0
libtpu: 0.0.40
codegen_flags: <defaults>
</compile_context>

<pallas_src>
import functools
import math

import jax
import jax.numpy as jnp
from jax import lax
from jax.experimental import pallas as pl
from jax.experimental.pallas import tpu as pltpu


def _round_up(x, m):
    return (x + m - 1) // m * m


def _attention_kernel(q_ref, w_ref, b_ref, k_ref, v_ref, o_ref,
                      qk_sc, m_sc, l_sc, acc_sc, *, tile, seq_len, masked):
    kv = pl.program_id(0)

    @pl.when(kv == 0)
    def _init():
        # nn.Linear: q = query @ W^T + b.  Contract dim 1 of query with dim 1
        # of W directly (no wrapper-side W.T, no in-kernel transpose); runs
        # once, projected q stays resident in VMEM scratch.
        qk_sc[...] = (lax.dot_general(
            q_ref[...], w_ref[...],
            dimension_numbers=(((1,), (1,)), ((), ())),
            preferred_element_type=jnp.float32) + b_ref[...])
        m_sc[...] = jnp.full(m_sc.shape, -jnp.inf, jnp.float32)
        l_sc[...] = jnp.zeros(l_sc.shape, jnp.float32)
        acc_sc[...] = jnp.zeros(acc_sc.shape, jnp.float32)

    # Scores for this key tile: (1, tile).  Contract the last dims so K is fed
    # to the MXU in its natural (tile, kdim) layout — no per-step transpose.
    s = lax.dot_general(qk_sc[...], k_ref[...],
                        dimension_numbers=(((1,), (1,)), ((), ())),
                        preferred_element_type=jnp.float32)
    v = v_ref[...]

    if masked:  # trace-time flag: only emitted when S % tile != 0
        # K/V are not padded in HBM, so rows past seq_len in the tail tile are
        # unspecified: mask their scores to -inf and zero their V rows so even
        # NaN garbage cannot poison the accumulators.  This VPU work is tiny
        # relative to (and hidden under) the K/V tile DMA.
        row = kv * tile + lax.broadcasted_iota(jnp.int32, (1, tile), 1)
        s = jnp.where(row < seq_len, s, -jnp.inf)
        col = kv * tile + lax.broadcasted_iota(jnp.int32, (tile, 1), 0)
        v = jnp.where(col < seq_len, v, 0.0)

    # Online softmax + weighted-value accumulation (flash-style).
    m_new = jnp.maximum(m_sc[...], jnp.max(s, axis=-1, keepdims=True))
    alpha = jnp.exp(m_sc[...] - m_new)
    p = jnp.exp(s - m_new)
    l_sc[...] = alpha * l_sc[...] + jnp.sum(p, axis=-1, keepdims=True)
    acc_sc[...] = alpha * acc_sc[...] + jnp.dot(
        p, v, preferred_element_type=jnp.float32)
    m_sc[...] = m_new

    @pl.when(kv == pl.num_programs(0) - 1)
    def _finalize():
        # Single dense store of the whole output row at the end.
        o_ref[...] = (acc_sc[...] / l_sc[...]).astype(o_ref.dtype)


def attention(query, weight, bias, key, value, *, block_s=2048):
    """query: (qdim,) f32.  weight: (kdim, qdim), bias: (kdim,) (nn.Linear params).
    key: (S, kdim) f32.  value: (S, vdim) f32.  Returns (vdim,) f32."""
    (qdim,) = query.shape
    seq_len, kdim = key.shape
    vdim = value.shape[1]
    assert weight.shape == (kdim, qdim)
    assert bias.shape == (kdim,)
    assert value.shape[0] == seq_len

    f32 = 4
    lane = lambda d: _round_up(d, 128)

    # Sequence tile: always a multiple of 8 sublanes, no larger than the
    # (rounded-up) sequence, shrunk if needed to fit the VMEM budget.
    tile = max(8, min(_round_up(block_s, 8), _round_up(seq_len, 8)))

    def vmem_bytes(t):
        resident = (8 * lane(qdim)                 # query
                    + _round_up(qdim, 8) * lane(kdim)   # weight
                    + 8 * lane(kdim)               # bias
                    + 8 * lane(vdim))              # output
        stream = t * (lane(kdim) + lane(vdim))     # key + value tiles
        scratch = 8 * (lane(kdim) + 2 * lane(1) + lane(vdim))
        return f32 * (2 * (resident + stream) + scratch)  # x2: double-buffered

    VMEM_BUDGET = 40 * 1024 * 1024  # conservative: leaves headroom on v7x (64 MiB)
    while tile > 8 and vmem_bytes(tile) > VMEM_BUDGET:
        tile = max(8, _round_up(tile // 2, 8))

    grid = pl.cdiv(seq_len, tile)
    masked = (seq_len % tile) != 0  # only then can the tail tile reach past S

    # Raise the scoped-VMEM limit above the 16/32 MiB defaults so large K/V
    # tiles can double-buffer; stay well under v7x's 64 MiB physical VMEM.
    vmem_limit = int(min(48 * 1024 * 1024,
                         max(32 * 1024 * 1024, vmem_bytes(tile) + (4 << 20))))

    q2 = query.reshape(1, qdim)
    b2 = bias.reshape(1, kdim)

    kernel = functools.partial(_attention_kernel, tile=tile, seq_len=seq_len,
                               masked=masked)

    out = pl.pallas_call(
        kernel,
        out_shape=jax.ShapeDtypeStruct((1, vdim), jnp.float32),
        grid_spec=pltpu.PrefetchScalarGridSpec(
            num_scalar_prefetch=0,
            grid=(grid,),
            in_specs=[
                pl.BlockSpec((1, qdim), lambda k: (0, 0)),      # query (resident)
                pl.BlockSpec((kdim, qdim), lambda k: (0, 0)),   # W     (resident)
                pl.BlockSpec((1, kdim), lambda k: (0, 0)),      # bias  (resident)
                pl.BlockSpec((tile, kdim), lambda k: (k, 0)),   # key tile
                pl.BlockSpec((tile, vdim), lambda k: (k, 0)),   # value tile
            ],
            out_specs=pl.BlockSpec((1, vdim), lambda k: (0, 0)),
            scratch_shapes=[
                pltpu.VMEM((1, kdim), jnp.float32),   # q = expansion(query)
                pltpu.VMEM((1, 1), jnp.float32),      # running max
                pltpu.VMEM((1, 1), jnp.float32),      # running denom
                pltpu.VMEM((1, vdim), jnp.float32),   # running weighted value
            ]),
        compiler_params=pltpu.CompilerParams(
            dimension_semantics=("arbitrary",),       # seq axis is a reduction
            vmem_limit_bytes=vmem_limit),
    )(q2, weight, b2, key, value)
    return out[0]


def reference(query, weight, bias, key, value):
    """Pure-JAX mirror of the PyTorch forward."""
    q = weight @ query + bias                 # nn.Linear
    scores = key @ q                          # torch.inner(q, key)
    w = jax.nn.softmax(scores, axis=0)        # softmax over dim 0
    return jnp.sum(value * w[:, None], axis=0)


if __name__ == "__main__":
    qdim, kdim, vdim = 16, 32, 32
    S = 20            # not a multiple of any tile -> exercises the tail mask

    root = jax.random.PRNGKey(0)
    kq, kw, kb, kk, kv = jax.random.split(root, 5)
    query = jax.random.normal(kq, (qdim,), dtype=jnp.float32)
    weight = jax.random.normal(kw, (kdim, qdim), dtype=jnp.float32) / math.sqrt(qdim)
    bias = jax.random.normal(kb, (kdim,), dtype=jnp.float32) * 0.1
    key = jax.random.normal(kk, (S, kdim), dtype=jnp.float32)
    value = jax.random.normal(kv, (S, vdim), dtype=jnp.float32)

    ref = reference(query, weight, bias, key, value)

    # 1) default (large) tile: single grid step, partial tail tile.
    out = jax.block_until_ready(attention(query, weight, bias, key, value))
    assert out.shape == (vdim,), out.shape
    assert jnp.allclose(out, ref, atol=1e-4, rtol=1e-4), (
        "mismatch (single tile); max abs err = "
        + str(float(jnp.max(jnp.abs(out - ref)))))

    # 2) tiny tile: multi-step online softmax + masked tail tile.
    out_small = jax.block_until_ready(
        attention(query, weight, bias, key, value, block_s=8))
    assert jnp.allclose(out_small, ref, atol=1e-4, rtol=1e-4), (
        "mismatch (multi tile); max abs err = "
        + str(float(jnp.max(jnp.abs(out_small - ref)))))

    print("KERNEL_OK")
</pallas_src>

<mosaic_0001>
module attributes {stable_mosaic.version = 11 : i64} {
  func.func @_attention_kernel(%arg0: i32, %arg1: memref<1x16xf32, #tpu.memory_space<vmem>>, %arg2: memref<32x16xf32, #tpu.memory_space<vmem>>, %arg3: memref<1x32xf32, #tpu.memory_space<vmem>>, %arg4: memref<24x32xf32, #tpu.memory_space<vmem>>, %arg5: memref<24x32xf32, #tpu.memory_space<vmem>>, %arg6: memref<1x32xf32, #tpu.memory_space<vmem>>, %arg7: memref<1x32xf32, #tpu.memory_space<vmem>>, %arg8: memref<1x1xf32, #tpu.memory_space<vmem>>, %arg9: memref<1x1xf32, #tpu.memory_space<vmem>>, %arg10: memref<1x32xf32, #tpu.memory_space<vmem>>) attributes {dimension_semantics = [#tpu.dimension_semantics<arbitrary>], iteration_bounds = array<i64: 1>, scalar_prefetch = 0 : i64, scratch_operands = 4 : i64, tpu.core_type = #tpu.core_type<tc>, window_params = [{pipeline_mode = #tpu.pipeline_mode<synchronous>, transform_indices = @transform_0, window_bounds = array<i64: 1, 16>}, {pipeline_mode = #tpu.pipeline_mode<synchronous>, transform_indices = @transform_1, window_bounds = array<i64: 32, 16>}, {pipeline_mode = #tpu.pipeline_mode<synchronous>, transform_indices = @transform_2, window_bounds = array<i64: 1, 32>}, {transform_indices = @transform_3, window_bounds = array<i64: 24, 32>}, {transform_indices = @transform_4, window_bounds = array<i64: 24, 32>}, {pipeline_mode = #tpu.pipeline_mode<synchronous>, transform_indices = @transform_5, window_bounds = array<i64: 1, 32>}]} {
    %c0_i32 = arith.constant 0 : i32
    %0 = arith.cmpi eq, %arg0, %c0_i32 : i32
    %1 = arith.extui %0 : i1 to i32
    %c0_i32_0 = arith.constant 0 : i32
    %2 = arith.cmpi ne, %1, %c0_i32_0 : i32
    scf.if %2 {
      %c0_29 = arith.constant 0 : index
      %c0_30 = arith.constant 0 : index
      %51 = vector.load %arg1[%c0_29, %c0_30] : memref<1x16xf32, #tpu.memory_space<vmem>>, vector<1x16xf32>
      %c0_31 = arith.constant 0 : index
      %c0_32 = arith.constant 0 : index
      %52 = vector.load %arg2[%c0_31, %c0_32] : memref<32x16xf32, #tpu.memory_space<vmem>>, vector<32x16xf32>
      %cst_33 = arith.constant dense<0.000000e+00> : vector<1x32xf32>
      %53 = tpu.matmul %51, %52, %cst_33 {dimension_numbers = #tpu.dot_dimension_numbers<[1], [1], [0], [0], [0, 0, 1, 0], [], []>} : vector<1x16xf32>, vector<32x16xf32>, vector<1x32xf32> -> vector<1x32xf32>
      %c0_34 = arith.constant 0 : index
      %c0_35 = arith.constant 0 : index
      %54 = vector.load %arg3[%c0_34, %c0_35] : memref<1x32xf32, #tpu.memory_space<vmem>>, vector<1x32xf32>
      %55 = arith.addf %53, %54 : vector<1x32xf32>
      %c0_36 = arith.constant 0 : index
      %c0_37 = arith.constant 0 : index
      %56 = vector.load %arg7[%c0_36, %c0_37] : memref<1x32xf32, #tpu.memory_space<vmem>>, vector<1x32xf32>
      tpu.vector_store %arg7[%c0_36, %c0_37], %55 {strides = array<i32>} : memref<1x32xf32, #tpu.memory_space<vmem>>, vector<1x32xf32>,
      %cst_38 = arith.constant 0xFF800000 : f32
      %57 = vector.broadcast %cst_38 : f32 to vector<1x1xf32>
      %c0_39 = arith.constant 0 : index
      %c0_40 = arith.constant 0 : index
      %58 = vector.load %arg8[%c0_39, %c0_40] : memref<1x1xf32, #tpu.memory_space<vmem>>, vector<1x1xf32>
      tpu.vector_store %arg8[%c0_39, %c0_40], %57 {strides = array<i32>} : memref<1x1xf32, #tpu.memory_space<vmem>>, vector<1x1xf32>,
      %cst_41 = arith.constant 0.000000e+00 : f32
      %59 = vector.broadcast %cst_41 : f32 to vector<1x1xf32>
      %c0_42 = arith.constant 0 : index
      %c0_43 = arith.constant 0 : index
      %60 = vector.load %arg9[%c0_42, %c0_43] : memref<1x1xf32, #tpu.memory_space<vmem>>, vector<1x1xf32>
      tpu.vector_store %arg9[%c0_42, %c0_43], %59 {strides = array<i32>} : memref<1x1xf32, #tpu.memory_space<vmem>>, vector<1x1xf32>,
      %cst_44 = arith.constant 0.000000e+00 : f32
      %61 = vector.broadcast %cst_44 : f32 to vector<1x32xf32>
      %c0_45 = arith.constant 0 : index
      %c0_46 = arith.constant 0 : index
      %62 = vector.load %arg10[%c0_45, %c0_46] : memref<1x32xf32, #tpu.memory_space<vmem>>, vector<1x32xf32>
      tpu.vector_store %arg10[%c0_45, %c0_46], %61 {strides = array<i32>} : memref<1x32xf32, #tpu.memory_space<vmem>>, vector<1x32xf32>,
    } else {
    }
    %c0 = arith.constant 0 : index
    %c0_1 = arith.constant 0 : index
    %3 = vector.load %arg7[%c0, %c0_1] : memref<1x32xf32, #tpu.memory_space<vmem>>, vector<1x32xf32>
    %c0_2 = arith.constant 0 : index
    %c0_3 = arith.constant 0 : index
    %4 = vector.load %arg4[%c0_2, %c0_3] : memref<24x32xf32, #tpu.memory_space<vmem>>, vector<24x32xf32>
    %cst = arith.constant dense<0.000000e+00> : vector<1x24xf32>
    %5 = tpu.matmul %3, %4, %cst {dimension_numbers = #tpu.dot_dimension_numbers<[1], [1], [0], [0], [0, 0, 1, 0], [], []>} : vector<1x32xf32>, vector<24x32xf32>, vector<1x24xf32> -> vector<1x24xf32>
    %c0_4 = arith.constant 0 : index
    %c0_5 = arith.constant 0 : index
    %6 = vector.load %arg5[%c0_4, %c0_5] : memref<24x32xf32, #tpu.memory_space<vmem>>, vector<24x32xf32>
    %c24_i32 = arith.constant 24 : i32
    %7 = arith.muli %arg0, %c24_i32 : i32
    %8 = tpu.iota {dimensions = array<i32: 1>} : vector<1x24xi32>
    %9 = vector.broadcast %7 : i32 to vector<1x24xi32>
    %10 = arith.addi %9, %8 : vector<1x24xi32>
    %c20_i32 = arith.constant 20 : i32
    %11 = vector.broadcast %c20_i32 : i32 to vector<1x24xi32>
    %12 = arith.cmpi slt, %10, %11 : vector<1x24xi32>
    %cst_6 = arith.constant 0xFF800000 : f32
    %13 = vector.broadcast %cst_6 : f32 to vector<1x24xf32>
    %14 = arith.select %12, %5, %13 : vector<1x24xi1>, vector<1x24xf32>
    %c24_i32_7 = arith.constant 24 : i32
    %15 = arith.muli %arg0, %c24_i32_7 : i32
    %16 = tpu.iota {dimensions = array<i32: 0>} : vector<24x1xi32>
    %17 = vector.broadcast %15 : i32 to vector<24x1xi32>
    %18 = arith.addi %17, %16 : vector<24x1xi32>
    %c20_i32_8 = arith.constant 20 : i32
    %19 = vector.broadcast %c20_i32_8 : i32 to vector<24x1xi32>
    %20 = arith.cmpi slt, %18, %19 : vector<24x1xi32>
    %cst_9 = arith.constant 0.000000e+00 : f32
    %21 = vector.shape_cast %20 : vector<24x1xi1> to vector<24x1xi1>
    %22 = vector.broadcast %21 : vector<24x1xi1> to vector<24x32xi1>
    %23 = vector.broadcast %cst_9 : f32 to vector<24x32xf32>
    %24 = arith.select %22, %6, %23 : vector<24x32xi1>, vector<24x32xf32>
    %c0_10 = arith.constant 0 : index
    %c0_11 = arith.constant 0 : index
    %25 = vector.load %arg8[%c0_10, %c0_11] : memref<1x1xf32, #tpu.memory_space<vmem>>, vector<1x1xf32>
    %cst_12 = arith.constant dense<0xFF800000> : vector<1xf32>
    %26 = vector.multi_reduction <maximumf>, %14, %cst_12 [1] : vector<1x24xf32> to vector<1xf32>
    %27 = vector.shape_cast %26 : vector<1xf32> to vector<1x1xf32>
    %28 = arith.maximumf %25, %27 : vector<1x1xf32>
    %c0_13 = arith.constant 0 : index
    %c0_14 = arith.constant 0 : index
    %29 = vector.load %arg8[%c0_13, %c0_14] : memref<1x1xf32, #tpu.memory_space<vmem>>, vector<1x1xf32>
    %30 = arith.subf %29, %28 : vector<1x1xf32>
    %31 = math.exp %30 : vector<1x1xf32>
    %32 = vector.broadcast %28 : vector<1x1xf32> to vector<1x24xf32>
    %33 = arith.subf %14, %32 : vector<1x24xf32>
    %34 = math.exp %33 : vector<1x24xf32>
    %c0_15 = arith.constant 0 : index
    %c0_16 = arith.constant 0 : index
    %35 = vector.load %arg9[%c0_15, %c0_16] : memref<1x1xf32, #tpu.memory_space<vmem>>, vector<1x1xf32>
    %36 = arith.mulf %31, %35 : vector<1x1xf32>
    %cst_17 = arith.constant dense<0.000000e+00> : vector<1xf32>
    %37 = vector.multi_reduction <add>, %34, %cst_17 [1] : vector<1x24xf32> to vector<1xf32>
    %38 = vector.shape_cast %37 : vector<1xf32> to vector<1x1xf32>
    %39 = arith.addf %36, %38 : vector<1x1xf32>
    %c0_18 = arith.constant 0 : index
    %c0_19 = arith.constant 0 : index
    %40 = vector.load %arg9[%c0_18, %c0_19] : memref<1x1xf32, #tpu.memory_space<vmem>>, vector<1x1xf32>
    tpu.vector_store %arg9[%c0_18, %c0_19], %39 {strides = array<i32>} : memref<1x1xf32, #tpu.memory_space<vmem>>, vector<1x1xf32>,
    %c0_20 = arith.constant 0 : index
    %c0_21 = arith.constant 0 : index
    %41 = vector.load %arg10[%c0_20, %c0_21] : memref<1x32xf32, #tpu.memory_space<vmem>>, vector<1x32xf32>
    %42 = vector.broadcast %31 : vector<1x1xf32> to vector<1x32xf32>
    %43 = arith.mulf %42, %41 : vector<1x32xf32>
    %cst_22 = arith.constant dense<0.000000e+00> : vector<1x32xf32>
    %44 = tpu.matmul %34, %24, %cst_22 {dimension_numbers = #tpu.dot_dimension_numbers<[1], [0], [0], [1], [0, 0, 1, 1], [], []>} : vector<1x24xf32>, vector<24x32xf32>, vector<1x32xf32> -> vector<1x32xf32>
    %45 = arith.addf %43, %44 : vector<1x32xf32>
    %c0_23 = arith.constant 0 : index
    %c0_24 = arith.constant 0 : index
    %46 = vector.load %arg10[%c0_23, %c0_24] : memref<1x32xf32, #tpu.memory_space<vmem>>, vector<1x32xf32>
    tpu.vector_store %arg10[%c0_23, %c0_24], %45 {strides = array<i32>} : memref<1x32xf32, #tpu.memory_space<vmem>>, vector<1x32xf32>,
    %c0_25 = arith.constant 0 : index
    %c0_26 = arith.constant 0 : index
    %47 = vector.load %arg8[%c0_25, %c0_26] : memref<1x1xf32, #tpu.memory_space<vmem>>, vector<1x1xf32>
    tpu.vector_store %arg8[%c0_25, %c0_26], %28 {strides = array<i32>} : memref<1x1xf32, #tpu.memory_space<vmem>>, vector<1x1xf32>,
    %c0_i32_27 = arith.constant 0 : i32
    %48 = arith.cmpi eq, %arg0, %c0_i32_27 : i32
    %49 = arith.extui %48 : i1 to i32
    %c0_i32_28 = arith.constant 0 : i32
    %50 = arith.cmpi ne, %49, %c0_i32_28 : i32
    scf.if %50 {
      %c0_29 = arith.constant 0 : index
      %c0_30 = arith.constant 0 : index
      %51 = vector.load %arg10[%c0_29, %c0_30] : memref<1x32xf32, #tpu.memory_space<vmem>>, vector<1x32xf32>
      %c0_31 = arith.constant 0 : index
      %c0_32 = arith.constant 0 : index
      %52 = vector.load %arg9[%c0_31, %c0_32] : memref<1x1xf32, #tpu.memory_space<vmem>>, vector<1x1xf32>
      %53 = vector.broadcast %52 : vector<1x1xf32> to vector<1x32xf32>
      %54 = arith.divf %51, %53 : vector<1x32xf32>
      %c0_33 = arith.constant 0 : index
      %c0_34 = arith.constant 0 : index
      %55 = vector.load %arg6[%c0_33, %c0_34] : memref<1x32xf32, #tpu.memory_space<vmem>>, vector<1x32xf32>
      tpu.vector_store %arg6[%c0_33, %c0_34], %54 {strides = array<i32>} : memref<1x32xf32, #tpu.memory_space<vmem>>, vector<1x32xf32>,
    } else {
    }
    return
  }
  func.func @transform_0(%arg0: i32) -> (i32, i32) {
    %c0_i32 = arith.constant 0 : i32
    %c0_i32_0 = arith.constant 0 : i32
    %c0_i32_1 = arith.constant 0 : i32
    return %c0_i32, %c0_i32_0 : i32, i32
  }
  func.func @transform_1(%arg0: i32) -> (i32, i32) {
    %c0_i32 = arith.constant 0 : i32
    %c0_i32_0 = arith.constant 0 : i32
    %c0_i32_1 = arith.constant 0 : i32
    return %c0_i32, %c0_i32_0 : i32, i32
  }
  func.func @transform_2(%arg0: i32) -> (i32, i32) {
    %c0_i32 = arith.constant 0 : i32
    %c0_i32_0 = arith.constant 0 : i32
    %c0_i32_1 = arith.constant 0 : i32
    return %c0_i32, %c0_i32_0 : i32, i32
  }
  func.func @transform_3(%arg0: i32) -> (i32, i32) {
    %c0_i32 = arith.constant 0 : i32
    %c0_i32_0 = arith.constant 0 : i32
    return %arg0, %c0_i32 : i32, i32
  }
  func.func @transform_4(%arg0: i32) -> (i32, i32) {
    %c0_i32 = arith.constant 0 : i32
    %c0_i32_0 = arith.constant 0 : i32
    return %arg0, %c0_i32 : i32, i32
  }
  func.func @transform_5(%arg0: i32) -> (i32, i32) {
    %c0_i32 = arith.constant 0 : i32
    %c0_i32_0 = arith.constant 0 : i32
    %c0_i32_1 = arith.constant 0 : i32
    return %c0_i32, %c0_i32_0 : i32, i32
  }
}

</mosaic_0001>

<bundles_post_ra>
// kernel: tpu_custom_call.1
= control target key start
LH: loop header
LB: loop body
LE: loop exit
PB: predicated region body
PF: predicated region fallthrough
CT: control target
= control target key end

     0   :  { %10 = vsyncpa [#allocation7], 0  ;;  %s650_s0 = inlined_call_operand.hbm [shape: f32[1,16], index: 0, kind: input, shape index: {}]   ;;  %s651_s1 = inlined_call_operand.vmem [shape: f32[32,16], index: 1, kind: input, shape index: {}]   ;;  %s652_s2 = inlined_call_operand.vmem [shape: f32[1,32], index: 2, kind: input, shape index: {}]   ;;  %s653_s3 = inlined_call_operand.vmem [shape: f32[20,32], index: 3, kind: input, shape index: {}]   ;;  %s654_s4 = inlined_call_operand.vmem [shape: f32[20,32], index: 4, kind: input, shape index: {}]   ;;  %s655_s5 = inlined_call_operand.hbm [shape: f32[1,32], index: 5, kind: output, shape index: {}]  }
   0x1   :  { %11 = vsyncpa [#allocation8], 0  ;;  %s532_s18 = smov [#allocation6]   ;;  %s484_s22 = scalar_lea.hbm %s650_s0, 16 }
   0x2   :  { %s18_s19 = sshll.u32 %s532_s18, 4  ;;  %p485_p0 = scmp.ne.s32.totalorder %s650_s0, %s484_s22  ;;  %s19_s19 = int_to_ptr.vmem [resolvable:$true] %s18_s19 }
   0x3   :  { %p488_p1 = scmp.lt.u32.totalorder %s484_s22, %s650_s0 }
   0x5   :  { %p490_p2 = pnand %p488_p1, %p485_p0 }
   0x7   :  { %493 = shalt.err (!%p490_p2)
}
   0x8   :  { %s494_s27 = scalar_lea.vmem %s19_s19, 16  ;;  %s498_s28 = scalar_lea.vmem %s19_s19, 32 }
   0x9   :  { %p495_p3 = scmp.ne.s32.totalorder %s19_s19, %s494_s27  ;;  %p499_p4 = scmp.lt.s32.totalorder %s19_s19, %s19_s19 }
   0xa   :  { %p500_p5 = scmp.lt.s32.totalorder %s498_s28, %s494_s27 }
   0xc   :  { %p501_p6 = por %p500_p5, %p499_p4 }
   0xe   :  { %p502_p7 = pnand %p501_p6, %p495_p3 }
  0x10   :  { %505 = shalt.err (!%p502_p7)
}
  0x11   :  { %21 = dma.hbm_to_vmem [thread:$0]  %s650_s0, 16, %s19_s19, [#allocation7]  }
  0x12   :  { %528 = dma.done.wait [#allocation7], 16  }
  0x13   :  { %529 = vsyncadd [#allocation7], 4294967280  ;;  %v533_v0 = vmov 0.0|0.0   ;;  %vm534_vm0 = vmmov 0   ;;  %v535_v1 = vmov 0.0   ;;  %vm43_vm1 = vcmask 130048  }
  0x14   :  { %454 = vmatprep.subr.bf16.mxu0 %v533_v0  ;;  %433 = vmatprep.mubr.msk.f32.mxu0 %vm534_vm0, %v535_v1  ;;  %v38_v2 = vld [vmem:[%s651_s1] sm:$0xff]  ;;  %v39_v3 = vld [vmem:[%s651_s1 + $0x8] sm:$0xff]  ;;  %vm456_vm2 = vmpackc.low %vm43_vm1, %vm43_vm1  ;;  %vm139_vm3 = vcmask 261120   ;;  %vm129_vm5 = vcmask 253952   ;;  %vm131_vm6 = vcmask 0   ;;  %v536_v18 = vmov -inf  }
  0x15   :  { %462 = vmatprep.subr.bf16.mxu1 %v533_v0  ;;  %442 = vmatprep.mubr.msk.f32.mxu1 %vm534_vm0, %v535_v1  ;;  %v455_v4 = vpack.c.bf16 %v39_v3, %v38_v2  ;;  %v40_v5 = vld [vmem:[%s651_s1 + $0x10] sm:$0xff]  ;;  %v41_v6 = vld [vmem:[%s651_s1 + $0x18] sm:$0xff]  ;;  %v37_v8 = vld [vmem:[#allocation6] sm:$0x1]  ;;  %134 = vst.msk [vmem:[#allocation5] sm:$0x1] %vm129_vm5, %v535_v1  ;;  %v226_v19 = vlaneseq }
  0x16   :  { %v459_v7 = vpack.c.bf16 %v41_v6, %v40_v5  ;;  %v136_v9 = vld [vmem:[%s653_s3] sm:$0xff]  ;;  %v137_v10 = vld [vmem:[%s653_s3 + $0x8] sm:$0xff]  ;;  %vm464_vm4 = vmpackc.low %vm139_vm3, %vm139_vm3  ;;  %132 = vst.msk [vmem:[#allocation3] sm:$0x1] %vm131_vm6, %v536_v18  ;;  %vm252_vm8 = vcmask 188416   ;;  %v537_v25 = vmov 0  }
  0x17   :  { %457 = vmatpush3.bf16.xpose.msk.msra.mxu0 %vm456_vm2, %v455_v4  ;;  %v463_v11 = vpack.c.bf16 %v137_v10, %v136_v9  ;;  %v138_v12 = vld [vmem:[%s653_s3 + $0x10] sm:$0xff]  ;;  %v42_v13 = vld [vmem:[%s652_s2] sm:$0x1]  ;;  %133 = vst.msk [vmem:[#allocation4] sm:$0x1] %vm131_vm6, %v535_v1  ;;  %v227_v20 = vand.u32 127, %v226_v19  ;;  %476 = vset.pattern.permute.xlu0 %v537_v25 }
  0x18   :  { %458 = vmatprep.subr.bf16.mxu0 %v533_v0  ;;  %477 = vset.pattern.permute.xlu1 %v537_v25  ;;  %v233_v30 = vshrl.u32 %v226_v19, 7  ;;  %v222_v31 = vld [vmem:[%s654_s4] sm:$0xff]  ;;  %v223_v32 = vld [vmem:[%s654_s4 + $0x8] sm:$0xff]  ;;  %v224_v35 = vld [vmem:[%s654_s4 + $0x10] sm:$0xff]  ;;  %vm291_vm10 = vcmask 195584   ;;  %s538_s4 = smov [#allocation9]  }
  0x19   :  { %465 = vmatpush3.bf16.xpose.msk.msra.mxu1 %vm464_vm4, %v463_v11  ;;  %vm230_vm7 = vcmp.lt.s32.totalorder %v227_v20, 20  ;;  %v467_v34 = vpack.c.bf16 %v223_v32, %v222_v31  ;;  %s392_s24 = sshll.u32 %s538_s4, 4  ;;  %s393_s24 = int_to_ptr.vmem [resolvable:$true] %s392_s24 }
  0x1a   :  { %440 = vmatprep.subr.mxu1 %v535_v1  ;;  %v235_v33 = vadd.s32 16, %v233_v30  ;;  %v267_v36 = vsub.s32 0, %v233_v30  ;;  %s506_s25 = scalar_lea.vmem %s393_s24, 16  ;;  %s510_s26 = scalar_lea.vmem %s393_s24, 32 }
  0x1b   :  { %p507_p8 = scmp.ne.s32.totalorder %s393_s24, %s506_s25  ;;  %p511_p9 = scmp.lt.s32.totalorder %s393_s24, %s393_s24 }
  0x1c   :  { %vm241_vm9 = vcmp.lt.s32.totalorder %v235_v33, 20  ;;  %v280_v52 = vld [vmem:[#allocation5] sm:$0x1]  ;;  %p512_p10 = scmp.lt.s32.totalorder %s510_s26, %s506_s25 }
  0x1d   :  { %v251_v26 = vld [vmem:[#allocation3] sm:$0x1] }
  0x1e   :  { %v272_v45 = vld [vmem:[#allocation4] sm:$0x1]  ;;  %p513_p11 = por %p512_p10, %p511_p9 }
  0x1f   :  { %461 = vmatpush3.bf16.xpose.msk.msra.mxu0 %vm456_vm2, %v459_v7 }
  0x20   :  { %p514_p12 = pnand %p513_p11, %p507_p8 }
  0x21   :  { %441 = vmatpush3.xpose.msk.msra.mxu1 %vm139_vm3, %v138_v12 }
  0x22   :  { %466 = vmatprep.subr.bf16.mxu1 %v533_v0 }
  0x26   :  { %434 = vmatmul.mubr.msk.f32.vlgmr.msra.gmra.mrb[0].mxu0 %vm43_vm1, %v37_v8 }
  0xf9   :  { %v125_v14 = vpop.f32.mrb[0].mxu0 }
  0xfa   :  { %v126_v15 = vadd.f32 %v125_v14, %v42_v13  ;;  %v435_v16 = vpop.f32.mrb[1].mxu0 }
  0xfc   :  { %130 = vst.msk [vmem:[#allocation2] sm:$0x1] %vm129_vm5, %v126_v15 }
 0x103   :  { %v135_v17 = vld [vmem:[#allocation2] sm:$0x1] }
 0x104   :  { %443 = vmatmul.mubr.msk.f32.vlgmr.msra.gmra.mrb[0].mxu1 %vm139_vm3, %v135_v17 }
 0x105   :  { %451 = vmatprep.mubr.msk.f32.mxu1 %vm534_vm0, %v535_v1  ;;  %468 = vmatpush3.bf16.msra.mxu1 %v467_v34 }
 0x106   :  { %449 = vmatprep.subr.mxu1 %v535_v1 }
 0x109   :  { %450 = vmatpush3.msk.msra.mxu1 %vm241_vm9, %v224_v35 }
 0x1d7   :  { %v218_v21 = vpop.f32.mrb[0].mxu1 }
 0x1d8   :  { %v231_v22 = vsel %vm230_vm7, %v218_v21, -inf  ;;  %v444_v23 = vpop.f32.mrb[1].mxu1 }
 0x1d9   :  { %v253_v24 = vsel %vm252_vm8, %v231_v22, -inf }
 0x1da   :  { %254 = vmax.xlane.f32.xlu0 %v253_v24 }
 0x267   :  { %v255_v27 = vpop.xlane.xlu0 %254 }
 0x268   :  { %v256_v28 = vmax.f32 %v251_v26, %v255_v27 }
 0x26a   :  { %v257_v29 = vsub.f32 %v251_v26, %v256_v28  ;;  %368 = vst.msk [vmem:[#allocation3] sm:$0x1] %vm131_vm6, %v256_v28  ;;  %262 = vperm.xlu0 %476, %v256_v28  }
 0x26c   :  { %v258_v43 = vmul.f32 1.442695, %v257_v29 }
 0x2e9   :  { %v263_v37 = vpop.permute.xlu0 %262 }
 0x2ea   :  { %v268_v38 = vrot.slane %v263_v37, %v267_v36 }
 0x2ec   :  { %v269_v39 = vsub.f32 %v231_v22, %v268_v38 }
 0x2ee   :  { %v270_v40 = vmul.f32 1.442695, %v269_v39 }
 0x2f0   :  { %478 = vpow2.f32 %v270_v40 }
 0x2f1   :  { %480 = vpow2.f32 %v258_v43 }
 0x2fa   :  { %v479_v41 = vpop.eup %478 }
 0x2fb   :  { %452 = vmatmul.mubr.msk.f32.vlgmr.msra.gmra.mrb[2].mxu1 %vm291_vm10, %v479_v41  ;;  %v274_v42 = vsel %vm252_vm8, %v479_v41, 0.0  ;;  %v481_v44 = vpop.eup %480 }
 0x2fc   :  { %275 = vadd.xlane.f32.xlu1 %v274_v42  ;;  %v273_v46 = vmul.f32 %v481_v44, %v272_v45 }
 0x30d   :  { %283 = vperm.xlu1 %477, %v481_v44  }
 0x389   :  { %v276_v47 = vpop.xlane.xlu1 %275 }
 0x38a   :  { %v277_v48 = vadd.f32 %v276_v47, %v273_v46 }
 0x38c   :  { %279 = vst.msk [vmem:[#allocation4] sm:$0x1] %vm131_vm6, %v277_v48 }
 0x38d   :  { %v284_v50 = vpop.permute.xlu1 %283 }
 0x38e   :  { %v289_v51 = vrot.slane %v284_v50, %v267_v36 }
 0x390   :  { %v290_v53 = vmul.f32 %v289_v51, %v280_v52 }
 0x393   :  { %v373_v49 = vld [vmem:[#allocation4] sm:$0x1] }
 0x394   :  { %376 = vperm.xlu1 %477, %v373_v49  }
 0x3ce   :  { %v361_v54 = vpop.f32.mrb[2].mxu1 }
 0x3cf   :  { %v365_v55 = vadd.f32 %v361_v54, %v290_v53  ;;  %v453_v56 = vpop.f32.mrb[3].mxu1 }
 0x3d1   :  { %367 = vst.msk [vmem:[#allocation5] sm:$0x1] %vm129_vm5, %v365_v55 }
 0x3d8   :  { %v372_v60 = vld [vmem:[#allocation5] sm:$0x1] }
 0x413   :  { %v377_v57 = vpop.permute.xlu1 %376 }
 0x414   :  { %v382_v58 = vrot.slane %v377_v57, %v267_v36 }
 0x416   :  { %482 = vrcp.f32 %v382_v58 }
 0x420   :  { %v483_v59 = vpop.eup %482 }
 0x421   :  { %v384_v61 = vmul.f32 %v483_v59, %v372_v60 }
 0x423   :  { %385 = vst.msk [vmem:[#allocation9] sm:$0x1] %vm129_vm5, %v384_v61 }
 0x424   :  { %517 = shalt.err (!%p514_p12)
}
 0x425   :  { %s518_s29 = scalar_lea.hbm %s655_s5, 16 }
 0x426   :  { %p519_p13 = scmp.ne.s32.totalorder %s655_s5, %s518_s29  ;;  %p522_p0 = scmp.lt.u32.totalorder %s518_s29, %s655_s5 }
 0x428   :  { %p524_p1 = pnand %p522_p0, %p519_p13 }
 0x42a   :  { %527 = shalt.err (!%p524_p1)
}
 0x42b   :  { %395 = dma.vmem_to_hbm [thread:$0]  %s393_s24, 16, %s655_s5, [#allocation8]  }
 0x42c   :  { %530 = dma.done.wait [#allocation8], 16  }
 0x42d   :  { %531 = vsyncadd [#allocation8], 4294967280 }
 0x42e   :  { %399 = vsyncpa [#allocation7], 1 }
 0x42f   :  { %400 = vsyncpa [#allocation8], 1 }

</bundles_post_ra>
